<compile_context>
chip_gen: v7x
topology: tpu7x:2x2x1
jax: 0.10.0
libtpu: 0.0.40
codegen_flags: <defaults>
</compile_context>

<pallas_src>
import functools

import numpy as np
import jax
import jax.numpy as jnp
from jax import lax
from jax.experimental import pallas as pl
from jax.experimental.pallas import tpu as pltpu


def _correlation_mlsm_kernel(pred_ref, label_ref, out_ref, *,
                             n_batch, n_cls, tile_b, inv_bc, need_row_mask):
    x = pred_ref[...].astype(jnp.float32)     # (TB, C)
    y = label_ref[...].astype(jnp.float32)    # (TB, C), binary {0,1}

    mask_one = y > 0.0                        # positive labels (matches torch: label > 0)
    mask_zero = y == 0.0                      # zero labels     (matches torch: label == 0)

    # ---- MultiLabelSoftMarginLoss term:  log1p(exp(-|x|)) + relu(x) - y*x ----
    per_elem = jnp.log1p(jnp.exp(-jnp.abs(x))) + jnp.maximum(x, 0.0) - y * x

    # ---- CorrelationLoss term: shift-stabilized factorization, single exp/elem ----
    neg_inf = jnp.float32(-jnp.inf)
    a_raw = jnp.max(jnp.where(mask_zero, x, neg_inf), axis=-1, keepdims=True)    # max over y==0
    b_raw = -jnp.max(jnp.where(mask_one, -x, neg_inf), axis=-1, keepdims=True)   # min over y>0
    n_one = jnp.sum(mask_one.astype(jnp.float32), axis=-1, keepdims=True)        # (TB, 1)
    n_zero = jnp.float32(n_cls) - n_one

    # clamp shifts to finite sentinels so degenerate rows never do inf/NaN arithmetic
    a = jnp.where(n_zero > 0.0, a_raw, 0.0)
    b = jnp.where(n_one > 0.0, b_raw, 0.0)

    # one shifted exponential per lane; exponents <= 0 on every selected lane -> no overflow
    shifted = jnp.where(mask_one, b - x, x - a)
    e = jnp.exp(shifted)
    s_one = jnp.sum(jnp.where(mask_one, e, 0.0), axis=-1, keepdims=True)
    s_zero = jnp.sum(jnp.where(mask_zero, e, 0.0), axis=-1, keepdims=True)

    loss_all_zero = jnp.exp(a - 1.0) * s_zero / jnp.maximum(n_zero, 1.0)
    loss_all_one = jnp.exp(-b) * s_one / jnp.maximum(n_one, 1.0)
    loss_mixed = jnp.exp(a - b) * s_one * s_zero / jnp.maximum(n_one * n_zero, 1.0)

    corr_i = jnp.where(n_one == 0.0, loss_all_zero,
                       jnp.where(n_zero == 0.0, loss_all_one, loss_mixed))   # (TB, 1)

    if need_row_mask:
        # only emitted when B % TB != 0: mask the ragged (unspecified) rows of the last block
        row = lax.broadcasted_iota(jnp.int32, (x.shape[0], 1), 0) + pl.program_id(0) * tile_b
        row_valid = row < n_batch
        mlsm_tile = jnp.sum(jnp.where(row_valid, per_elem, 0.0))
        corr_tile = jnp.sum(jnp.where(row_valid, corr_i, 0.0))
    else:
        mlsm_tile = jnp.sum(per_elem)
        corr_tile = jnp.sum(corr_i)

    tile_total = mlsm_tile * inv_bc + corr_tile
    out_ref[...] = jnp.broadcast_to(tile_total, (1, 1, 128))


def correlation_mlsm_loss(pred, label, *, batch_tile=None):
    """pred/label: [batch, classes]. pred f32 (or bf16); label f32/bf16/int8 with binary values."""
    assert pred.ndim == 2 and pred.shape == label.shape
    B, C = pred.shape
    assert B >= 1 and C >= 1

    pred_bytes = jnp.dtype(pred.dtype).itemsize
    label_bytes = jnp.dtype(label.dtype).itemsize

    # Per-row VMEM: 2x double-buffered input blocks + ~8 live f32 (TB, C) temporaries.
    per_row_bytes = 2 * (pred_bytes + label_bytes) * C + 8 * 4 * C

    if batch_tile is None:
        budget_bytes = 32 * 1024 * 1024              # total block budget; safe on v7x (64 MiB VMEM)
        tb = budget_bytes // per_row_bytes
        tb = max(32, (tb // 32) * 32)                # multiple of 32 (int8 sublane packing)
        batch_tile = min(tb, 1024)
    batch_tile = int(batch_tile)

    if batch_tile >= B or B <= 32:
        TB = B                                       # single full-extent block, no row masking
    else:
        TB = max(32, (batch_tile // 32) * 32)        # < B here, multiple of 32

    num_tiles = (B + TB - 1) // TB
    need_row_mask = (B % TB) != 0

    vmem_limit = per_row_bytes * TB + (4 << 20)
    vmem_limit = int(min(max(vmem_limit, 16 * 1024 * 1024), 100 * 1024 * 1024))

    kernel = functools.partial(
        _correlation_mlsm_kernel,
        n_batch=B, n_cls=C, tile_b=TB,
        inv_bc=1.0 / float(B * C),
        need_row_mask=need_row_mask,
    )

    partials = pl.pallas_call(
        kernel,
        out_shape=jax.ShapeDtypeStruct((num_tiles, 1, 128), jnp.float32),
        grid_spec=pltpu.PrefetchScalarGridSpec(
            num_scalar_prefetch=0,
            grid=(num_tiles,),
            in_specs=[
                pl.BlockSpec((TB, C), lambda i: (i, 0)),   # full-extent class axis: no padding
                pl.BlockSpec((TB, C), lambda i: (i, 0)),
            ],
            out_specs=pl.BlockSpec((1, 1, 128), lambda i: (i, 0, 0)),
        ),
        compiler_params=pltpu.CompilerParams(
            dimension_semantics=("parallel",),   # per-tile partials -> no cross-iteration carry
            vmem_limit_bytes=vmem_limit,
        ),
    )(pred, label)

    return jnp.sum(partials[:, 0, 0])


def _reference_loss(pred, label):
    """Pure-numpy replica of the PyTorch module (2-D inputs, binary labels)."""
    x = np.asarray(pred, dtype=np.float64)
    y = np.asarray(label, dtype=np.float64)
    B, C = x.shape

    def logsig(v):
        return np.minimum(v, 0.0) - np.log1p(np.exp(-np.abs(v)))

    mlsm = np.mean(-(y * logsig(x) + (1.0 - y) * logsig(-x)))

    total = 0.0
    for i in range(B):
        one = x[i][y[i] > 0]
        zero = x[i][y[i] == 0]
        n1, n0 = one.size, zero.size
        if n1 == 0:
            total += np.sum(np.exp(zero - 1.0)) / n0
        elif n0 == 0:
            total += np.sum(np.exp(-one)) / n1
        else:
            total += np.sum(np.exp(-(one[:, None] - zero[None, :]))) / (n1 * n0)
    return mlsm + total


if __name__ == "__main__":
    key = jax.random.PRNGKey(0)
    k_pred, k_lab = jax.random.split(key)

    B, C = 4, 16
    pred = jax.random.normal(k_pred, (B, C), dtype=jnp.float32)
    # int8 labels (bandwidth-friendly); exercise mixed rows, an all-zeros row, an all-ones row
    lab_rand = (jax.random.uniform(k_lab, (2, C)) > 0.5).astype(jnp.int8)
    label = jnp.concatenate(
        [lab_rand, jnp.zeros((1, C), jnp.int8), jnp.ones((1, C), jnp.int8)], axis=0
    )

    out = correlation_mlsm_loss(pred, label)
    jax.block_until_ready(out)

    ref = _reference_loss(pred, label)
    assert np.allclose(float(out), float(ref), rtol=1e-4, atol=1e-4), (float(out), float(ref))

    print("KERNEL_OK")
</pallas_src>

<mosaic_0001>
module attributes {stable_mosaic.version = 11 : i64} {
  func.func @_correlation_mlsm_kernel(%arg0: i32, %arg1: memref<4x16xf32, #tpu.memory_space<vmem>>, %arg2: memref<4x16xi8, #tpu.memory_space<vmem>>, %arg3: memref<1x1x128xf32, #tpu.memory_space<vmem>>) attributes {dimension_semantics = [#tpu.dimension_semantics<parallel>], iteration_bounds = array<i64: 1>, scalar_prefetch = 0 : i64, scratch_operands = 0 : i64, tpu.core_type = #tpu.core_type<tc>, window_params = [{transform_indices = @transform_0, window_bounds = array<i64: 4, 16>}, {transform_indices = @transform_1, window_bounds = array<i64: 4, 16>}, {transform_indices = @transform_2, window_bounds = array<i64: 1, 1, 128>}]} {
    %c0 = arith.constant 0 : index
    %c0_0 = arith.constant 0 : index
    %0 = vector.load %arg1[%c0, %c0_0] : memref<4x16xf32, #tpu.memory_space<vmem>>, vector<4x16xf32>
    %c0_1 = arith.constant 0 : index
    %c0_2 = arith.constant 0 : index
    %1 = vector.load %arg2[%c0_1, %c0_2] : memref<4x16xi8, #tpu.memory_space<vmem>>, vector<4x16xi8>
    %2 = arith.sitofp %1 : vector<4x16xi8> to vector<4x16xf32>
    %cst = arith.constant 0.000000e+00 : f32
    %3 = vector.broadcast %cst : f32 to vector<4x16xf32>
    %4 = arith.cmpf ogt, %2, %3 : vector<4x16xf32>
    %cst_3 = arith.constant 0.000000e+00 : f32
    %5 = vector.broadcast %cst_3 : f32 to vector<4x16xf32>
    %6 = arith.cmpf oeq, %2, %5 : vector<4x16xf32>
    %7 = math.absf %0 : vector<4x16xf32>
    %cst_4 = arith.constant 0.000000e+00 : f32
    %8 = vector.broadcast %cst_4 : f32 to vector<4x16xf32>
    %9 = arith.subf %8, %7 : vector<4x16xf32>
    %10 = math.exp %9 : vector<4x16xf32>
    %11 = math.log1p %10 : vector<4x16xf32>
    %cst_5 = arith.constant 0.000000e+00 : f32
    %12 = vector.broadcast %cst_5 : f32 to vector<4x16xf32>
    %13 = arith.maximumf %0, %12 : vector<4x16xf32>
    %14 = arith.addf %11, %13 : vector<4x16xf32>
    %15 = arith.mulf %2, %0 : vector<4x16xf32>
    %16 = arith.subf %14, %15 : vector<4x16xf32>
    %cst_6 = arith.constant 0xFF800000 : f32
    %17 = vector.broadcast %cst_6 : f32 to vector<4x16xf32>
    %18 = arith.select %6, %0, %17 : vector<4x16xi1>, vector<4x16xf32>
    %cst_7 = arith.constant dense<0xFF800000> : vector<4xf32>
    %19 = vector.multi_reduction <maximumf>, %18, %cst_7 [1] : vector<4x16xf32> to vector<4xf32>
    %20 = vector.shape_cast %19 : vector<4xf32> to vector<4x1xf32>
    %cst_8 = arith.constant 0.000000e+00 : f32
    %21 = vector.broadcast %cst_8 : f32 to vector<4x16xf32>
    %22 = arith.subf %21, %0 : vector<4x16xf32>
    %cst_9 = arith.constant 0xFF800000 : f32
    %23 = vector.broadcast %cst_9 : f32 to vector<4x16xf32>
    %24 = arith.select %4, %22, %23 : vector<4x16xi1>, vector<4x16xf32>
    %cst_10 = arith.constant dense<0xFF800000> : vector<4xf32>
    %25 = vector.multi_reduction <maximumf>, %24, %cst_10 [1] : vector<4x16xf32> to vector<4xf32>
    %26 = vector.shape_cast %25 : vector<4xf32> to vector<4x1xf32>
    %cst_11 = arith.constant 0.000000e+00 : f32
    %27 = vector.broadcast %cst_11 : f32 to vector<4x1xf32>
    %28 = arith.subf %27, %26 : vector<4x1xf32>
    %29 = arith.extui %4 : vector<4x16xi1> to vector<4x16xi32>
    %30 = arith.sitofp %29 : vector<4x16xi32> to vector<4x16xf32>
    %cst_12 = arith.constant dense<0.000000e+00> : vector<4xf32>
    %31 = vector.multi_reduction <add>, %30, %cst_12 [1] : vector<4x16xf32> to vector<4xf32>
    %32 = vector.shape_cast %31 : vector<4xf32> to vector<4x1xf32>
    %cst_13 = arith.constant 1.600000e+01 : f32
    %33 = vector.broadcast %cst_13 : f32 to vector<4x1xf32>
    %34 = arith.subf %33, %32 : vector<4x1xf32>
    %cst_14 = arith.constant 0.000000e+00 : f32
    %35 = vector.broadcast %cst_14 : f32 to vector<4x1xf32>
    %36 = arith.cmpf ogt, %34, %35 : vector<4x1xf32>
    %cst_15 = arith.constant 0.000000e+00 : f32
    %37 = vector.broadcast %cst_15 : f32 to vector<4x1xf32>
    %38 = arith.select %36, %20, %37 : vector<4x1xi1>, vector<4x1xf32>
    %cst_16 = arith.constant 0.000000e+00 : f32
    %39 = vector.broadcast %cst_16 : f32 to vector<4x1xf32>
    %40 = arith.cmpf ogt, %32, %39 : vector<4x1xf32>
    %cst_17 = arith.constant 0.000000e+00 : f32
    %41 = vector.broadcast %cst_17 : f32 to vector<4x1xf32>
    %42 = arith.select %40, %28, %41 : vector<4x1xi1>, vector<4x1xf32>
    %43 = vector.broadcast %42 : vector<4x1xf32> to vector<4x16xf32>
    %44 = arith.subf %43, %0 : vector<4x16xf32>
    %45 = vector.broadcast %38 : vector<4x1xf32> to vector<4x16xf32>
    %46 = arith.subf %0, %45 : vector<4x16xf32>
    %47 = arith.select %4, %44, %46 : vector<4x16xi1>, vector<4x16xf32>
    %48 = math.exp %47 : vector<4x16xf32>
    %cst_18 = arith.constant 0.000000e+00 : f32
    %49 = vector.broadcast %cst_18 : f32 to vector<4x16xf32>
    %50 = arith.select %4, %48, %49 : vector<4x16xi1>, vector<4x16xf32>
    %cst_19 = arith.constant dense<0.000000e+00> : vector<4xf32>
    %51 = vector.multi_reduction <add>, %50, %cst_19 [1] : vector<4x16xf32> to vector<4xf32>
    %52 = vector.shape_cast %51 : vector<4xf32> to vector<4x1xf32>
    %cst_20 = arith.constant 0.000000e+00 : f32
    %53 = vector.broadcast %cst_20 : f32 to vector<4x16xf32>
    %54 = arith.select %6, %48, %53 : vector<4x16xi1>, vector<4x16xf32>
    %cst_21 = arith.constant dense<0.000000e+00> : vector<4xf32>
    %55 = vector.multi_reduction <add>, %54, %cst_21 [1] : vector<4x16xf32> to vector<4xf32>
    %56 = vector.shape_cast %55 : vector<4xf32> to vector<4x1xf32>
    %cst_22 = arith.constant 1.000000e+00 : f32
    %57 = vector.broadcast %cst_22 : f32 to vector<4x1xf32>
    %58 = arith.subf %38, %57 : vector<4x1xf32>
    %59 = math.exp %58 : vector<4x1xf32>
    %60 = arith.mulf %59, %56 : vector<4x1xf32>
    %cst_23 = arith.constant 1.000000e+00 : f32
    %61 = vector.broadcast %cst_23 : f32 to vector<4x1xf32>
    %62 = arith.maximumf %34, %61 : vector<4x1xf32>
    %63 = arith.divf %60, %62 : vector<4x1xf32>
    %cst_24 = arith.constant 0.000000e+00 : f32
    %64 = vector.broadcast %cst_24 : f32 to vector<4x1xf32>
    %65 = arith.subf %64, %42 : vector<4x1xf32>
    %66 = math.exp %65 : vector<4x1xf32>
    %67 = arith.mulf %66, %52 : vector<4x1xf32>
    %cst_25 = arith.constant 1.000000e+00 : f32
    %68 = vector.broadcast %cst_25 : f32 to vector<4x1xf32>
    %69 = arith.maximumf %32, %68 : vector<4x1xf32>
    %70 = arith.divf %67, %69 : vector<4x1xf32>
    %71 = arith.subf %38, %42 : vector<4x1xf32>
    %72 = math.exp %71 : vector<4x1xf32>
    %73 = arith.mulf %72, %52 : vector<4x1xf32>
    %74 = arith.mulf %73, %56 : vector<4x1xf32>
    %75 = arith.mulf %32, %34 : vector<4x1xf32>
    %cst_26 = arith.constant 1.000000e+00 : f32
    %76 = vector.broadcast %cst_26 : f32 to vector<4x1xf32>
    %77 = arith.maximumf %75, %76 : vector<4x1xf32>
    %78 = arith.divf %74, %77 : vector<4x1xf32>
    %cst_27 = arith.constant 0.000000e+00 : f32
    %79 = vector.broadcast %cst_27 : f32 to vector<4x1xf32>
    %80 = arith.cmpf oeq, %32, %79 : vector<4x1xf32>
    %cst_28 = arith.constant 0.000000e+00 : f32
    %81 = vector.broadcast %cst_28 : f32 to vector<4x1xf32>
    %82 = arith.cmpf oeq, %34, %81 : vector<4x1xf32>
    %83 = arith.select %82, %70, %78 : vector<4x1xi1>, vector<4x1xf32>
    %84 = arith.select %80, %63, %83 : vector<4x1xi1>, vector<4x1xf32>
    %85 = vector.shape_cast %16 : vector<4x16xf32> to vector<1x4x16xf32>
    %cst_29 = arith.constant dense<0.000000e+00> : vector<1xf32>
    %86 = vector.multi_reduction <add>, %85, %cst_29 [1, 2] : vector<1x4x16xf32> to vector<1xf32>
    %87 = vector.shape_cast %86 : vector<1xf32> to vector<1x1x1xf32>
    %88 = vector.extract %87[0, 0, 0] : f32 from vector<1x1x1xf32>
    %89 = vector.shape_cast %84 : vector<4x1xf32> to vector<1x4x1xf32>
    %cst_30 = arith.constant dense<0.000000e+00> : vector<1xf32>
    %90 = vector.multi_reduction <add>, %89, %cst_30 [1, 2] : vector<1x4x1xf32> to vector<1xf32>
    %91 = vector.shape_cast %90 : vector<1xf32> to vector<1x1x1xf32>
    %92 = vector.extract %91[0, 0, 0] : f32 from vector<1x1x1xf32>
    %cst_31 = arith.constant 1.562500e-02 : f32
    %93 = arith.mulf %88, %cst_31 : f32
    %94 = arith.addf %93, %92 : f32
    %95 = vector.broadcast %94 : f32 to vector<1x1x128xf32>
    %c0_32 = arith.constant 0 : index
    %c0_33 = arith.constant 0 : index
    %c0_34 = arith.constant 0 : index
    %96 = vector.load %arg3[%c0_32, %c0_33, %c0_34] : memref<1x1x128xf32, #tpu.memory_space<vmem>>, vector<1x1x128xf32>
    tpu.vector_store %arg3[%c0_32, %c0_33, %c0_34], %95 {strides = array<i32>} : memref<1x1x128xf32, #tpu.memory_space<vmem>>, vector<1x1x128xf32>,
    return
  }
  func.func @transform_0(%arg0: i32) -> (i32, i32) {
    %c0_i32 = arith.constant 0 : i32
    %c0_i32_0 = arith.constant 0 : i32
    return %arg0, %c0_i32 : i32, i32
  }
  func.func @transform_1(%arg0: i32) -> (i32, i32) {
    %c0_i32 = arith.constant 0 : i32
    %c0_i32_0 = arith.constant 0 : i32
    return %arg0, %c0_i32 : i32, i32
  }
  func.func @transform_2(%arg0: i32) -> (i32, i32, i32) {
    %c0_i32 = arith.constant 0 : i32
    %c0_i32_0 = arith.constant 0 : i32
    %c0_i32_1 = arith.constant 0 : i32
    return %arg0, %c0_i32, %c0_i32_0 : i32, i32, i32
  }
}

</mosaic_0001>

<bundles_post_ra>
// kernel: tpu_custom_call.1
= control target key start
LH: loop header
LB: loop body
LE: loop exit
PB: predicated region body
PF: predicated region fallthrough
CT: control target
= control target key end

     0   :  { %7 = vsyncpa [#allocation3], 0  ;;  %s293_s0 = inlined_call_operand.hbm [shape: f32[4,16], index: 0, kind: input, shape index: {}]   ;;  %s294_s1 = inlined_call_operand.vmem [shape: s8[4,16], index: 1, kind: input, shape index: {}]   ;;  %s295_s2 = inlined_call_operand.hbm [shape: f32[1,1,128], index: 2, kind: output, shape index: {}]  }
   0x1   :  { %8 = vsyncpa [#allocation4], 0  ;;  %s223_s9 = smov [#allocation2]   ;;  %s175_s13 = scalar_lea.hbm %s293_s0, 64 }
   0x2   :  { %s15_s10 = sshll.u32 %s223_s9, 4  ;;  %p176_p0 = scmp.ne.s32.totalorder %s293_s0, %s175_s13  ;;  %s16_s10 = int_to_ptr.vmem [resolvable:$true] %s15_s10 }
   0x3   :  { %p179_p1 = scmp.lt.u32.totalorder %s175_s13, %s293_s0 }
   0x5   :  { %p181_p2 = pnand %p179_p1, %p176_p0 }
   0x7   :  { %184 = shalt.err (!%p181_p2)
}
   0x8   :  { %s185_s18 = scalar_lea.vmem %s16_s10, 64  ;;  %p190_p4 = scmp.lt.s32.totalorder %s16_s10, %s16_s10 }
   0x9   :  { %p186_p3 = scmp.ne.s32.totalorder %s16_s10, %s185_s18  ;;  %p191_p5 = scmp.lt.s32.totalorder %s185_s18, %s185_s18 }
   0xb   :  { %p192_p6 = por %p191_p5, %p190_p4 }
   0xd   :  { %p193_p7 = pnand %p192_p6, %p186_p3 }
   0xf   :  { %196 = shalt.err (!%p193_p7)
}
  0x10   :  { %18 = dma.hbm_to_vmem [thread:$0]  %s293_s0, 64, %s16_s10, [#allocation3]  }
  0x11   :  { %219 = dma.done.wait [#allocation3], 64  }
  0x12   :  { %220 = vsyncadd [#allocation3], 4294967232  ;;  %v25_v0 = vld [vmem:[%s294_s1] sm:$0x1]  ;;  %vm48_vm0 = vcmask 125952   ;;  %v224_v5 = vmov 0.0  }
  0x13   :  { %v24_v1 = vld [vmem:[#allocation2] sm:$0xf]  ;;  %v26_v2 = vunpack.c.0.s8 %v25_v0  ;;  %vm118_vm7 = vcmask 3072   ;;  %s225_s23 = smov [#allocation5]  }
  0x14   :  { %v52_v3 = vsub.f32 0.0, %v24_v1  ;;  %v30_v12 = vand.u32 2147483647, %v24_v1  ;;  %v43_v41 = vmax.f32 %v24_v1, 0.0  ;;  %s139_s24 = sshll.u32 %s225_s23, 4  ;;  %s140_s24 = int_to_ptr.vmem [resolvable:$true] %s139_s24 }
  0x15   :  { %v27_v4 = vcvt.s32.f32 %v26_v2  ;;  %s197_s27 = scalar_lea.vmem %s140_s24, 16  ;;  %s201_s28 = scalar_lea.vmem %s140_s24, 32 }
  0x16   :  { %v31_v14 = vsub.f32 0.0, %v30_v12  ;;  %p198_p8 = scmp.ne.s32.totalorder %s140_s24, %s197_s27  ;;  %p202_p9 = scmp.lt.s32.totalorder %s140_s24, %s140_s24 }
  0x17   :  { %vm28_vm1 = vcmp.gt.f32.partialorder %v27_v4, 0.0  ;;  %vm29_vm2 = vcmp.eq.f32.partialorder %v27_v4, 0.0  ;;  %v45_v44 = vmul.f32 %v27_v4, %v24_v1  ;;  %p203_p10 = scmp.lt.s32.totalorder %s201_s28, %s197_s27 }
  0x18   :  { %v148_v6 = vsel %vm28_vm1, 1.0, %v224_v5  ;;  %v47_v7 = vsel %vm29_vm2, %v24_v1, -inf  ;;  %v53_v8 = vsel %vm28_vm1, %v52_v3, -inf  ;;  %v32_v19 = vmul.f32 1.442695, %v31_v14 }
  0x19   :  { %v60_v9 = vsel %vm48_vm0, %v148_v6, 0.0  ;;  %v49_v10 = vsel %vm48_vm0, %v47_v7, -inf  ;;  %v54_v11 = vsel %vm48_vm0, %v53_v8, -inf  ;;  %p204_p11 = por %p203_p10, %p202_p9 }
  0x1a   :  { %61 = vadd.xlane.f32.xlu0 %v60_v9  ;;  %50 = vmax.xlane.f32.xlu1 %v49_v10  ;;  %157 = vpow2.f32 %v32_v19 }
  0x1b   :  { %p205_p12 = pnand %p204_p11, %p198_p8 }
  0x1e   :  { %55 = vmax.xlane.f32.xlu0 %v54_v11 }
  0x24   :  { %v158_v28 = vpop.eup %157 }
  0x25   :  { %v34_v29 = vadd.f32 1.0, %v158_v28  ;;  %v37_v35 = vmul.f32 -0.5, %v158_v28  ;;  %v40_v38 = vand.u32 2147483647, %v158_v28 }
  0x27   :  { %v38_v36 = vadd.f32 1.0, %v37_v35  ;;  %vm41_vm5 = vcmp.lt.f32.partialorder %v40_v38, 0.0004427343 }
  0x29   :  { %v39_v40 = vmul.f32 %v158_v28, %v38_v36 }
  0xa7   :  { %v262_v13 = vpop.xlane.xlu0 %61  ;;  %v51_v16 = vpop.xlane.xlu1 %50 }
  0xa8   :  { %v265_v15 = vsub.f32 16.0, %v262_v13  ;;  %vm66_vm4 = vcmp.gt.f32.partialorder %v262_v13, 0.0  ;;  %v92_v52 = vmax.f32 %v262_v13, 1.0  ;;  %vm104_vm8 = vcmp.eq.f32.partialorder %v262_v13, 0.0 }
  0xaa   :  { %v100_v17 = vmul.f32 %v265_v15, %v262_v13  ;;  %vm64_vm3 = vcmp.gt.f32.partialorder %v265_v15, 0.0  ;;  %v85_v53 = vmax.f32 %v265_v15, 1.0  ;;  %vm105_vm6 = vcmp.eq.f32.partialorder %v265_v15, 0.0 }
  0xab   :  { %v56_v18 = vpop.xlane.xlu0 %55  ;;  %v65_v20 = vsel %vm64_vm3, %v51_v16, 0.0 }
  0xac   :  { %v57_v21 = vsub.f32 0.0, %v56_v18  ;;  %v69_v23 = vsub.f32 %v24_v1, %v65_v20  ;;  %v149_v47 = vadd.f32 -1.0, %v65_v20  ;;  %v101_v54 = vmax.f32 %v100_v17, 1.0 }
  0xae   :  { %v67_v22 = vsel %vm66_vm4, %v57_v21, 0.0  ;;  %v82_v49 = vmul.f32 1.442695, %v149_v47 }
  0xaf   :  { %v68_v24 = vsub.f32 %v67_v22, %v24_v1  ;;  %v95_v25 = vsub.f32 %v65_v20, %v67_v22  ;;  %v88_v48 = vsub.f32 0.0, %v67_v22 }
  0xb1   :  { %v70_v26 = vsel %vm28_vm1, %v68_v24, %v69_v23  ;;  %v89_v50 = vmul.f32 1.442695, %v88_v48  ;;  %v96_v51 = vmul.f32 1.442695, %v95_v25 }
  0xb2   :  { %v71_v27 = vmul.f32 1.442695, %v70_v26 }
  0xb4   :  { %159 = vpow2.f32 %v71_v27 }
  0xb5   :  { %161 = vlog2.f32 %v34_v29 }
  0xb6   :  { %163 = vpow2.f32 %v82_v49 }
  0xb7   :  { %165 = vpow2.f32 %v89_v50 }
  0xb8   :  { %167 = vpow2.f32 %v96_v51 }
  0xb9   :  { %169 = vrcp.f32 %v92_v52 }
  0xba   :  { %171 = vrcp.f32 %v85_v53 }
  0xbb   :  { %173 = vrcp.f32 %v101_v54 }
  0xbe   :  { %v160_v30 = vpop.eup %159 }
  0xbf   :  { %v77_v31 = vsel %vm29_vm2, %v160_v30, 0.0  ;;  %v73_v32 = vsel %vm28_vm1, %v160_v30, 0.0  ;;  %v162_v37 = vpop.eup %161 }
  0xc0   :  { %v78_v33 = vsel %vm48_vm0, %v77_v31, 0.0  ;;  %v74_v34 = vsel %vm48_vm0, %v73_v32, 0.0  ;;  %v36_v39 = vmul.f32 0.6931472, %v162_v37  ;;  %v164_v55 = vpop.eup %163 }
  0xc1   :  { %79 = vadd.xlane.f32.xlu0 %v78_v33  ;;  %75 = vadd.xlane.f32.xlu1 %v74_v34  ;;  %v166_v56 = vpop.eup %165 }
  0xc2   :  { %v42_v42 = vsel %vm41_vm5, %v39_v40, %v36_v39  ;;  %v168_v57 = vpop.eup %167 }
  0xc3   :  { %v44_v43 = vadd.f32 %v43_v41, %v42_v42  ;;  %v170_v60 = vpop.eup %169 }
  0xc4   :  { %v172_v0 = vpop.eup %171 }
  0xc5   :  { %v46_v45 = vsub.f32 %v44_v43, %v45_v44  ;;  %v174_v4 = vpop.eup %173 }
  0xc7   :  { %v108_v46 = vsel %vm48_vm0, %v46_v45, 0.0 }
  0xc8   :  { %109 = vadd.xlane.f32.xlu1 %v108_v46 }
 0x14e   :  { %v80_v58 = vpop.xlane.xlu0 %79  ;;  %v76_v59 = vpop.xlane.xlu1 %75 }
 0x14f   :  { %v84_v61 = vmul.f32 %v164_v55, %v80_v58  ;;  %v91_v62 = vmul.f32 %v166_v56, %v76_v59  ;;  %v98_v63 = vmul.f32 %v168_v57, %v76_v59 }
 0x151   :  { %v87_v1 = vmul.f32 %v172_v0, %v84_v61  ;;  %v94_v2 = vmul.f32 %v170_v60, %v91_v62  ;;  %v99_v3 = vmul.f32 %v98_v63, %v80_v58 }
 0x153   :  { %v103_v5 = vmul.f32 %v174_v4, %v99_v3 }
 0x155   :  { %v106_v6 = vsel %vm105_vm6, %v94_v2, %v103_v5  ;;  %v110_v9 = vpop.xlane.xlu1 %109 }
 0x156   :  { %v107_v7 = vsel %vm104_vm8, %v87_v1, %v106_v6  ;;  %v111_v10 = vrot.slane %v110_v9, 4 }
 0x157   :  { %v119_v8 = vsel %vm118_vm7, %v107_v7, 0.0 }
 0x158   :  { %120 = vadd.xlane.f32.xlu0 %v119_v8  ;;  %v112_v11 = vadd.f32 %v111_v10, %v110_v9 }
 0x15a   :  { %v113_v12 = vrot.slane %v112_v11, 2 }
 0x15c   :  { %v114_v14 = vadd.f32 %v113_v12, %v112_v11 }
 0x15e   :  { %v115_v16 = vrot.slane %v114_v14, 1 }
 0x160   :  { %v116_v17 = vadd.f32 %v115_v16, %v114_v14 }
 0x162   :  { %150 = vpush %v116_v17 }
 0x193   :  { %s151_s0 = spop %150 }
 0x194   :  { %s129_s1 = smul.f32 0.015625, %s151_s0 }
 0x1e5   :  { %v121_v18 = vpop.xlane.xlu0 %120 }
 0x1e6   :  { %v122_v19 = vrot.slane %v121_v18, 4 }
 0x1e8   :  { %v123_v20 = vadd.f32 %v122_v19, %v121_v18 }
 0x1ea   :  { %v124_v21 = vrot.slane %v123_v20, 2 }
 0x1ec   :  { %v125_v15 = vadd.f32 %v124_v21, %v123_v20 }
 0x1ee   :  { %v126_v22 = vrot.slane %v125_v15, 1 }
 0x1f0   :  { %v127_v23 = vadd.f32 %v126_v22, %v125_v15 }
 0x1f2   :  { %152 = vpush %v127_v23 }
 0x223   :  { %s153_s25 = spop %152 }
 0x224   :  { %s130_s26 = sadd.f32 %s153_s25, %s129_s1 }
 0x226   :  { %v131_v13 = vstv %s130_s26 }
 0x227   :  { %132 = vst [vmem:[#allocation5] sm:$0x1] %v131_v13 }
 0x228   :  { %208 = shalt.err (!%p205_p12)
}
 0x229   :  { %s209_s3 = scalar_lea.hbm %s295_s2, 16 }
 0x22a   :  { %p210_p13 = scmp.ne.s32.totalorder %s295_s2, %s209_s3  ;;  %p213_p0 = scmp.lt.u32.totalorder %s209_s3, %s295_s2 }
 0x22c   :  { %p215_p1 = pnand %p213_p0, %p210_p13 }
 0x22e   :  { %218 = shalt.err (!%p215_p1)
}
 0x22f   :  { %142 = dma.vmem_to_hbm [thread:$0]  %s140_s24, 16, %s295_s2, [#allocation4]  }
 0x230   :  { %221 = dma.done.wait [#allocation4], 16  }
 0x231   :  { %222 = vsyncadd [#allocation4], 4294967280 }
 0x232   :  { %146 = vsyncpa [#allocation3], 1 }
 0x233   :  { %147 = vsyncpa [#allocation4], 1 }

</bundles_post_ra>
